<compile_context>
chip_gen: v7x
topology: tpu7x:2x2x1
jax: 0.10.0
libtpu: 0.0.40
codegen_flags: <defaults>
</compile_context>

<pallas_src>
import functools

import numpy as np
import jax
import jax.numpy as jnp
from jax import lax
from jax.experimental import pallas as pl
from jax.experimental.pallas import tpu as pltpu


# ----------------------------------------------------------------------------
# Kernel 1: folded-BN conv (as one matmul) -> relu -> fc -> relu => (B, dim).
# ----------------------------------------------------------------------------
def _conve_feature_kernel(img_ref, wconv_ref, bconv_ref, wfc_ref, bfc_ref,
                          feat_ref):
    """img_ref   : (TB, H*W)        f32 VMEM  raw flattened "image" rows
       wconv_ref : (H*W, C*OHOW)    f32 VMEM  bn0/bn1-folded conv-as-matmul matrix
       bconv_ref : (1, C*OHOW)      f32 VMEM  bn0/bn1-folded conv bias (per position)
       wfc_ref   : (C*OHOW, dim)    f32 VMEM  bn2-folded fc weight
       bfc_ref   : (1, dim)         f32 VMEM  bn2-folded fc bias
       feat_ref  : (TB, dim)        f32 VMEM  output features
    """
    # conv(bn0(x)) with bn1 folded in, as a single MXU matmul.
    h = jnp.dot(img_ref[...], wconv_ref[...], preferred_element_type=jnp.float32)
    h = jnp.maximum(h + bconv_ref[...], 0.0)                       # relu
    # fc with bn2 folded in — one MXU matmul over the full C*OHOW contraction.
    f = jnp.dot(h, wfc_ref[...], preferred_element_type=jnp.float32)
    feat_ref[...] = jnp.maximum(f + bfc_ref[...], 0.0)             # relu


def _feature_pallas(img, conv_mat, bconv, wfc, bfc, tb):
    B, HW = img.shape
    dim = wfc.shape[1]
    num_b = B // tb
    return pl.pallas_call(
        _conve_feature_kernel,
        out_shape=jax.ShapeDtypeStruct((B, dim), jnp.float32),
        grid_spec=pltpu.PrefetchScalarGridSpec(
            num_scalar_prefetch=0,
            grid=(num_b,),
            in_specs=[
                pl.BlockSpec((tb, HW), lambda i: (i, 0)),          # img (streamed over B)
                pl.BlockSpec(conv_mat.shape, lambda i: (0, 0)),    # conv matrix (resident)
                pl.BlockSpec(bconv.shape, lambda i: (0, 0)),       # conv bias   (resident)
                pl.BlockSpec(wfc.shape, lambda i: (0, 0)),         # fc weight   (resident)
                pl.BlockSpec(bfc.shape, lambda i: (0, 0)),         # fc bias     (resident)
            ],
            out_specs=pl.BlockSpec((tb, dim), lambda i: (i, 0)),
        ),
        compiler_params=pltpu.CompilerParams(
            dimension_semantics=("parallel",),        # v7x: B tiles shard over 2 TCs
            vmem_limit_bytes=48 * 1024 * 1024),       # stay under v7x's 64 MiB/TC
    )(img, conv_mat, bconv, wfc, bfc)


# ----------------------------------------------------------------------------
# Kernel 2: scoring  sigmoid(feat @ E^T + bias), Ne tiled lane-dense & parallel.
# ----------------------------------------------------------------------------
def _conve_score_kernel(feat_ref, et_ref, bias_ref, out_ref):
    """feat_ref : (B, dim)   f32  resident
       et_ref   : (dim, TN)  bf16 streamed (pre-transposed, pre-padded, bf16 at setup)
       bias_ref : (1, TN)    f32  streamed
       out_ref  : (B, TN)    f32
    """
    f = feat_ref[...].astype(jnp.bfloat16)                         # tiny per-tile cast
    s = jnp.dot(f, et_ref[...], preferred_element_type=jnp.float32)
    out_ref[...] = jax.nn.sigmoid(s + bias_ref[...]).astype(out_ref.dtype)


def _score_pallas(feat, et_pad, bias_pad, tn):
    B, dim = feat.shape
    ne_pad = et_pad.shape[1]
    num_tiles = ne_pad // tn
    return pl.pallas_call(
        _conve_score_kernel,
        out_shape=jax.ShapeDtypeStruct((B, ne_pad), jnp.float32),
        grid_spec=pltpu.PrefetchScalarGridSpec(
            num_scalar_prefetch=0,
            grid=(num_tiles,),
            in_specs=[
                pl.BlockSpec((B, dim), lambda j: (0, 0)),    # feat (resident)
                pl.BlockSpec((dim, tn), lambda j: (0, j)),   # E^T bf16 (streamed, lane-dense)
                pl.BlockSpec((1, tn), lambda j: (0, j)),     # bias (streamed)
            ],
            out_specs=pl.BlockSpec((B, tn), lambda j: (0, j)),
        ),
        compiler_params=pltpu.CompilerParams(
            dimension_semantics=("parallel",),               # v7x: tiles shard over 2 TCs
            vmem_limit_bytes=48 * 1024 * 1024),
    )(feat, et_pad, bias_pad)


# ----------------------------------------------------------------------------
# Forward wrapper (mirrors ConvE.forward in eval mode).
# ----------------------------------------------------------------------------
@functools.partial(jax.jit, static_argnames=("k_w", "k_h"))
def conve_forward(batch_inputs, params, *, k_w, k_h):
    head = batch_inputs[:, 0]
    relation = batch_inputs[:, 1]
    e_embed = params["entity_emb"][head]          # gather glue (nn.Embedding)
    r_embed = params["relation_emb"][relation]
    B, dim = e_embed.shape
    H, W = 2 * k_w, k_h

    # Build the flattened (B, H*W) "image" exactly like the PyTorch cat/transpose/reshape.
    embed = jnp.stack([e_embed, r_embed], axis=1)                  # (B, 2, dim)
    img = jnp.transpose(embed, (0, 2, 1)).reshape(B, H * W)

    # Kernel 1: features. B tiling (128-row tiles if divisible, else single tile).
    tb = 128 if (B % 128 == 0) else B
    feat = _feature_pallas(img, params["conv_mat"], params["bconv"],
                           params["wfc"], params["bfc"], tb)       # (B, dim) f32

    # Kernel 2: scoring against all entities (E^T bf16, transposed & padded at setup).
    et_pad = params["entity_embT_pad"]                             # (dim, Ne_pad) bf16
    bias_pad = params["bias_pad"]                                  # (1, Ne_pad)   f32
    ne = params["entity_emb"].shape[0]
    ne_pad = et_pad.shape[1]
    tn = 1024 if ne_pad % 1024 == 0 else ne_pad                    # Ne pre-padded to tile
    pred_pad = _score_pallas(feat, et_pad, bias_pad, tn)           # (B, Ne_pad)
    return pred_pad[:, :ne]


# ----------------------------------------------------------------------------
# Pure-JAX reference (mirrors the PyTorch module op-for-op, eval mode).
# ----------------------------------------------------------------------------
def _reference(batch_inputs, params, *, k_w, k_h):
    eps = 1e-5
    e = params["entity_emb"][batch_inputs[:, 0]]
    r = params["relation_emb"][batch_inputs[:, 1]]
    B, dim = e.shape
    conv_w = params["conv_w"]
    embed = jnp.stack([e, r], axis=1)
    x = jnp.transpose(embed, (0, 2, 1)).reshape(B, 1, 2 * k_w, k_h)
    # bn0 (BatchNorm2d(1), eval)
    x = ((x - params["bn0_mean"][None, :, None, None])
         / jnp.sqrt(params["bn0_var"] + eps)[None, :, None, None]
         * params["bn0_gamma"][None, :, None, None]
         + params["bn0_beta"][None, :, None, None])
    x = lax.conv_general_dilated(x, conv_w, window_strides=(1, 1), padding="VALID",
                                 dimension_numbers=("NCHW", "OIHW", "NCHW"))
    x = x + params["conv_b"][None, :, None, None]
    # bn1 (BatchNorm2d(C), eval)
    x = ((x - params["bn1_mean"][None, :, None, None])
         / jnp.sqrt(params["bn1_var"] + eps)[None, :, None, None]
         * params["bn1_gamma"][None, :, None, None]
         + params["bn1_beta"][None, :, None, None])
    x = jax.nn.relu(x)
    x = x.reshape(B, -1)
    x = x @ params["fc_w"].T + params["fc_b"]
    # bn2 (BatchNorm1d(dim), eval)
    x = ((x - params["bn2_mean"]) / jnp.sqrt(params["bn2_var"] + eps)
         * params["bn2_gamma"] + params["bn2_beta"])
    x = jax.nn.relu(x)
    pred = x @ params["entity_emb"].T + params["bias"][None, :]
    return jax.nn.sigmoid(pred)


# ----------------------------------------------------------------------------
# Deterministic parameter construction + one-time kernel-side preprocessing.
# ----------------------------------------------------------------------------
def _make_params(key, num_entities, num_relations, dim, out_channels, kernel_size,
                 k_w, k_h):
    eps = 1e-5
    K = kernel_size
    H, W = 2 * k_w, k_h
    OH, OW = H - K + 1, W - K + 1
    OHOW = OH * OW
    flat_sz = out_channels * OHOW
    ks = list(jax.random.split(key, 20))
    it = iter(ks)

    std_e = (2.0 / (num_entities + dim)) ** 0.5
    std_r = (2.0 / (2 * num_relations + dim)) ** 0.5
    entity_emb = std_e * jax.random.normal(next(it), (num_entities, dim), jnp.float32)
    relation_emb = std_r * jax.random.normal(next(it), (2 * num_relations, dim), jnp.float32)

    conv_w = 0.3 * jax.random.normal(next(it), (out_channels, 1, K, K), jnp.float32)
    conv_b = 0.1 * jax.random.normal(next(it), (out_channels,), jnp.float32)
    fc_w = (flat_sz ** -0.5) * jax.random.normal(next(it), (dim, flat_sz), jnp.float32)
    fc_b = 0.1 * jax.random.normal(next(it), (dim,), jnp.float32)
    bias = 0.1 * jax.random.normal(next(it), (num_entities,), jnp.float32)

    def bn(shape):
        g = 1.0 + 0.1 * jax.random.normal(next(it), shape, jnp.float32)
        b = 0.1 * jax.random.normal(next(it), shape, jnp.float32)
        m = 0.1 * jax.random.normal(next(it), shape, jnp.float32)
        v = 1.0 + 0.5 * jnp.abs(jax.random.normal(next(it), shape, jnp.float32))
        return g, b, m, v

    bn0_gamma, bn0_beta, bn0_mean, bn0_var = bn((1,))
    bn1_gamma, bn1_beta, bn1_mean, bn1_var = bn((out_channels,))
    bn2_gamma, bn2_beta, bn2_mean, bn2_var = bn((dim,))

    # ---- One-time folding (hoisted out of the per-call path) ------------------
    s0 = bn0_gamma / jnp.sqrt(bn0_var + eps)                       # (1,)
    t0 = bn0_beta - bn0_mean * s0
    s1 = bn1_gamma / jnp.sqrt(bn1_var + eps)                       # (C,)
    t1 = bn1_beta - bn1_mean * s1
    s2 = bn2_gamma / jnp.sqrt(bn2_var + eps)                       # (dim,)
    t2 = bn2_beta - bn2_mean * s2

    wc = conv_w[:, 0]                                              # (C, K, K)
    # bn0/bn1-folded tap weights and per-channel bias (exact, eval-mode running stats).
    w_fold = np.asarray(s1)[:, None, None] * float(s0[0]) * np.asarray(wc)  # (C,K,K)
    bconv_c = s1 * (conv_b + t0[0] * wc.sum(axis=(1, 2))) + t1     # (C,)

    # Dense "conv-as-matmul" matrix: conv_mat[(i+di)*W+(j+dj), c*OHOW + i*OW + j]
    #   = w_fold[c, di, dj], matching the PyTorch NCHW flatten order (c, i, j).
    conv_mat_np = np.zeros((H * W, out_channels, OH, OW), np.float32)
    for di in range(K):
        for dj in range(K):
            for i in range(OH):
                for j in range(OW):
                    conv_mat_np[(i + di) * W + (j + dj), :, i, j] += w_fold[:, di, dj]
    conv_mat = jnp.asarray(conv_mat_np.reshape(H * W, flat_sz))    # (H*W, C*OHOW)
    bconv = jnp.repeat(bconv_c, OHOW)[None, :]                     # (1, C*OHOW)

    # bn2-folded fc weight/bias (single contraction over C*OHOW).
    wfc = (fc_w * s2[:, None]).T                                   # (C*OHOW, dim)
    bfc = (fc_b * s2 + t2)[None, :]                                # (1, dim)

    # Scoring-side constants: transpose + pad to the scoring tile ONCE, store bf16.
    tile = 1024 if num_entities >= 1024 else 128
    ne_pad = ((num_entities + tile - 1) // tile) * tile
    entity_embT_pad = (jnp.zeros((dim, ne_pad), jnp.bfloat16)
                       .at[:, :num_entities].set(entity_emb.T.astype(jnp.bfloat16)))
    bias_pad = jnp.zeros((1, ne_pad), jnp.float32).at[:, :num_entities].set(bias[None, :])

    return {
        # raw module parameters (used by the reference / gathers)
        "entity_emb": entity_emb, "relation_emb": relation_emb,
        "conv_w": conv_w, "conv_b": conv_b,
        "fc_w": fc_w, "fc_b": fc_b, "bias": bias,
        "bn0_gamma": bn0_gamma, "bn0_beta": bn0_beta, "bn0_mean": bn0_mean, "bn0_var": bn0_var,
        "bn1_gamma": bn1_gamma, "bn1_beta": bn1_beta, "bn1_mean": bn1_mean, "bn1_var": bn1_var,
        "bn2_gamma": bn2_gamma, "bn2_beta": bn2_beta, "bn2_mean": bn2_mean, "bn2_var": bn2_var,
        # kernel-side pre-folded constants
        "conv_mat": conv_mat, "bconv": bconv, "wfc": wfc, "bfc": bfc,
        "entity_embT_pad": entity_embT_pad, "bias_pad": bias_pad,
    }


if __name__ == "__main__":
    # Small shapes consistent with the module: dim = k_w * k_h.
    k_w, k_h = 4, 8
    dim = k_w * k_h                 # 32
    kernel_size = 3
    out_channels = 4
    num_entities = 64
    num_relations = 10              # relation embedding table has 2 * num_relations rows
    B = 8

    key = jax.random.PRNGKey(0)
    kp, kh_, kr_ = jax.random.split(key, 3)
    params = _make_params(kp, num_entities, num_relations, dim, out_channels,
                          kernel_size, k_w, k_h)

    heads = jax.random.randint(kh_, (B, 1), 0, num_entities, jnp.int32)
    rels = jax.random.randint(kr_, (B, 1), 0, 2 * num_relations, jnp.int32)
    batch_inputs = jnp.concatenate([heads, rels], axis=1)          # (B, 2)

    out = conve_forward(batch_inputs, params, k_w=k_w, k_h=k_h)
    out = jax.block_until_ready(out)

    ref = _reference(batch_inputs, params, k_w=k_w, k_h=k_h)
    assert out.shape == (B, num_entities)
    max_err = float(jnp.max(jnp.abs(out - ref)))
    # bf16 E^T / feat in the scoring matmul (f32 accumulation) -> ~1e-2 tolerance.
    assert jnp.allclose(out, ref, rtol=2e-2, atol=2e-2), \
        f"mismatch vs reference (max abs err {max_err})"

    print("KERNEL_OK")
</pallas_src>

<mosaic_0001>
module attributes {stable_mosaic.version = 11 : i64} {
  func.func @_conve_score_kernel(%arg0: i32, %arg1: memref<8x32xf32, #tpu.memory_space<vmem>>, %arg2: memref<32x128xbf16, #tpu.memory_space<vmem>>, %arg3: memref<1x128xf32, #tpu.memory_space<vmem>>, %arg4: memref<8x128xf32, #tpu.memory_space<vmem>>) attributes {dimension_semantics = [#tpu.dimension_semantics<parallel>], iteration_bounds = array<i64: 1>, scalar_prefetch = 0 : i64, scratch_operands = 0 : i64, tpu.core_type = #tpu.core_type<tc>, window_params = [{pipeline_mode = #tpu.pipeline_mode<synchronous>, transform_indices = @transform_0, window_bounds = array<i64: 8, 32>}, {transform_indices = @transform_1, window_bounds = array<i64: 32, 128>}, {transform_indices = @transform_2, window_bounds = array<i64: 1, 128>}, {transform_indices = @transform_3, window_bounds = array<i64: 8, 128>}]} {
    %c0 = arith.constant 0 : index
    %c0_0 = arith.constant 0 : index
    %0 = vector.load %arg1[%c0, %c0_0] : memref<8x32xf32, #tpu.memory_space<vmem>>, vector<8x32xf32>
    %1 = arith.truncf %0 : vector<8x32xf32> to vector<8x32xbf16>
    %c0_1 = arith.constant 0 : index
    %c0_2 = arith.constant 0 : index
    %2 = vector.load %arg2[%c0_1, %c0_2] : memref<32x128xbf16, #tpu.memory_space<vmem>>, vector<32x128xbf16>
    %cst = arith.constant dense<0.000000e+00> : vector<8x128xf32>
    %3 = tpu.matmul %1, %2, %cst {dimension_numbers = #tpu.dot_dimension_numbers<[1], [0], [0], [1], [0, 0, 1, 1], [], []>} : vector<8x32xbf16>, vector<32x128xbf16>, vector<8x128xf32> -> vector<8x128xf32>
    %c0_3 = arith.constant 0 : index
    %c0_4 = arith.constant 0 : index
    %4 = vector.load %arg3[%c0_3, %c0_4] : memref<1x128xf32, #tpu.memory_space<vmem>>, vector<1x128xf32>
    %5 = vector.broadcast %4 : vector<1x128xf32> to vector<8x128xf32>
    %6 = arith.addf %3, %5 : vector<8x128xf32>
    %7 = arith.negf %6 : vector<8x128xf32>
    %8 = math.exp %7 : vector<8x128xf32>
    %cst_5 = arith.constant 1.000000e+00 : f32
    %9 = vector.broadcast %cst_5 : f32 to vector<8x128xf32>
    %10 = arith.addf %9, %8 : vector<8x128xf32>
    %11 = arith.divf %9, %10 : vector<8x128xf32>
    %c0_6 = arith.constant 0 : index
    %c0_7 = arith.constant 0 : index
    %12 = vector.load %arg4[%c0_6, %c0_7] : memref<8x128xf32, #tpu.memory_space<vmem>>, vector<8x128xf32>
    tpu.vector_store %arg4[%c0_6, %c0_7], %11 {strides = array<i32>} : memref<8x128xf32, #tpu.memory_space<vmem>>, vector<8x128xf32>,
    return
  }
  func.func @transform_0(%arg0: i32) -> (i32, i32) {
    %c0_i32 = arith.constant 0 : i32
    %c0_i32_0 = arith.constant 0 : i32
    %c0_i32_1 = arith.constant 0 : i32
    return %c0_i32, %c0_i32_0 : i32, i32
  }
  func.func @transform_1(%arg0: i32) -> (i32, i32) {
    %c0_i32 = arith.constant 0 : i32
    %c0_i32_0 = arith.constant 0 : i32
    return %c0_i32, %arg0 : i32, i32
  }
  func.func @transform_2(%arg0: i32) -> (i32, i32) {
    %c0_i32 = arith.constant 0 : i32
    %c0_i32_0 = arith.constant 0 : i32
    return %c0_i32, %arg0 : i32, i32
  }
  func.func @transform_3(%arg0: i32) -> (i32, i32) {
    %c0_i32 = arith.constant 0 : i32
    %c0_i32_0 = arith.constant 0 : i32
    return %c0_i32, %arg0 : i32, i32
  }
}

module attributes {stable_mosaic.version = 11 : i64} {
  func.func @_conve_feature_kernel(%arg0: i32, %arg1: memref<8x64xf32, #tpu.memory_space<vmem>>, %arg2: memref<64x144xf32, #tpu.memory_space<vmem>>, %arg3: memref<1x144xf32, #tpu.memory_space<vmem>>, %arg4: memref<144x32xf32, #tpu.memory_space<vmem>>, %arg5: memref<1x32xf32, #tpu.memory_space<vmem>>, %arg6: memref<8x32xf32, #tpu.memory_space<vmem>>) attributes {dimension_semantics = [#tpu.dimension_semantics<parallel>], iteration_bounds = array<i64: 1>, scalar_prefetch = 0 : i64, scratch_operands = 0 : i64, tpu.core_type = #tpu.core_type<tc>, window_params = [{transform_indices = @transform_0, window_bounds = array<i64: 8, 64>}, {pipeline_mode = #tpu.pipeline_mode<synchronous>, transform_indices = @transform_1, window_bounds = array<i64: 64, 144>}, {pipeline_mode = #tpu.pipeline_mode<synchronous>, transform_indices = @transform_2, window_bounds = array<i64: 1, 144>}, {pipeline_mode = #tpu.pipeline_mode<synchronous>, transform_indices = @transform_3, window_bounds = array<i64: 144, 32>}, {pipeline_mode = #tpu.pipeline_mode<synchronous>, transform_indices = @transform_4, window_bounds = array<i64: 1, 32>}, {transform_indices = @transform_5, window_bounds = array<i64: 8, 32>}]} {
    %c0 = arith.constant 0 : index
    %c0_0 = arith.constant 0 : index
    %0 = vector.load %arg1[%c0, %c0_0] : memref<8x64xf32, #tpu.memory_space<vmem>>, vector<8x64xf32>
    %c0_1 = arith.constant 0 : index
    %c0_2 = arith.constant 0 : index
    %1 = vector.load %arg2[%c0_1, %c0_2] : memref<64x144xf32, #tpu.memory_space<vmem>>, vector<64x144xf32>
    %cst = arith.constant dense<0.000000e+00> : vector<8x144xf32>
    %2 = tpu.matmul %0, %1, %cst {dimension_numbers = #tpu.dot_dimension_numbers<[1], [0], [0], [1], [0, 0, 1, 1], [], []>} : vector<8x64xf32>, vector<64x144xf32>, vector<8x144xf32> -> vector<8x144xf32>
    %c0_3 = arith.constant 0 : index
    %c0_4 = arith.constant 0 : index
    %3 = vector.load %arg3[%c0_3, %c0_4] : memref<1x144xf32, #tpu.memory_space<vmem>>, vector<1x144xf32>
    %4 = vector.broadcast %3 : vector<1x144xf32> to vector<8x144xf32>
    %5 = arith.addf %2, %4 : vector<8x144xf32>
    %cst_5 = arith.constant 0.000000e+00 : f32
    %6 = vector.broadcast %cst_5 : f32 to vector<8x144xf32>
    %7 = arith.maximumf %5, %6 : vector<8x144xf32>
    %c0_6 = arith.constant 0 : index
    %c0_7 = arith.constant 0 : index
    %8 = vector.load %arg4[%c0_6, %c0_7] : memref<144x32xf32, #tpu.memory_space<vmem>>, vector<144x32xf32>
    %cst_8 = arith.constant dense<0.000000e+00> : vector<8x32xf32>
    %9 = tpu.matmul %7, %8, %cst_8 {dimension_numbers = #tpu.dot_dimension_numbers<[1], [0], [0], [1], [0, 0, 1, 1], [], []>} : vector<8x144xf32>, vector<144x32xf32>, vector<8x32xf32> -> vector<8x32xf32>
    %c0_9 = arith.constant 0 : index
    %c0_10 = arith.constant 0 : index
    %10 = vector.load %arg5[%c0_9, %c0_10] : memref<1x32xf32, #tpu.memory_space<vmem>>, vector<1x32xf32>
    %11 = vector.broadcast %10 : vector<1x32xf32> to vector<8x32xf32>
    %12 = arith.addf %9, %11 : vector<8x32xf32>
    %cst_11 = arith.constant 0.000000e+00 : f32
    %13 = vector.broadcast %cst_11 : f32 to vector<8x32xf32>
    %14 = arith.maximumf %12, %13 : vector<8x32xf32>
    %c0_12 = arith.constant 0 : index
    %c0_13 = arith.constant 0 : index
    %15 = vector.load %arg6[%c0_12, %c0_13] : memref<8x32xf32, #tpu.memory_space<vmem>>, vector<8x32xf32>
    tpu.vector_store %arg6[%c0_12, %c0_13], %14 {strides = array<i32>} : memref<8x32xf32, #tpu.memory_space<vmem>>, vector<8x32xf32>,
    return
  }
  func.func @transform_0(%arg0: i32) -> (i32, i32) {
    %c0_i32 = arith.constant 0 : i32
    %c0_i32_0 = arith.constant 0 : i32
    return %arg0, %c0_i32 : i32, i32
  }
  func.func @transform_1(%arg0: i32) -> (i32, i32) {
    %c0_i32 = arith.constant 0 : i32
    %c0_i32_0 = arith.constant 0 : i32
    %c0_i32_1 = arith.constant 0 : i32
    return %c0_i32, %c0_i32_0 : i32, i32
  }
  func.func @transform_2(%arg0: i32) -> (i32, i32) {
    %c0_i32 = arith.constant 0 : i32
    %c0_i32_0 = arith.constant 0 : i32
    %c0_i32_1 = arith.constant 0 : i32
    return %c0_i32, %c0_i32_0 : i32, i32
  }
  func.func @transform_3(%arg0: i32) -> (i32, i32) {
    %c0_i32 = arith.constant 0 : i32
    %c0_i32_0 = arith.constant 0 : i32
    %c0_i32_1 = arith.constant 0 : i32
    return %c0_i32, %c0_i32_0 : i32, i32
  }
  func.func @transform_4(%arg0: i32) -> (i32, i32) {
    %c0_i32 = arith.constant 0 : i32
    %c0_i32_0 = arith.constant 0 : i32
    %c0_i32_1 = arith.constant 0 : i32
    return %c0_i32, %c0_i32_0 : i32, i32
  }
  func.func @transform_5(%arg0: i32) -> (i32, i32) {
    %c0_i32 = arith.constant 0 : i32
    %c0_i32_0 = arith.constant 0 : i32
    return %arg0, %c0_i32 : i32, i32
  }
}

</mosaic_0001>

<bundles_post_ra>
// kernel: conve_forward.3
= control target key start
LH: loop header
LB: loop body
LE: loop exit
PB: predicated region body
PF: predicated region fallthrough
CT: control target
= control target key end

     0   :  { %v155_v1 = vmov 0.0   ;;  %vm156_vm0 = vmmov 0   ;;  %s202_s0 = inlined_call_operand.vmem [shape: f32[8,32], index: 0, kind: input, shape index: {}]   ;;  %s203_s1 = inlined_call_operand.vmem [shape: bf16[32,128], index: 1, kind: input, shape index: {}]   ;;  %s204_s2 = inlined_call_operand.vmem [shape: f32[1,128], index: 2, kind: input, shape index: {}]   ;;  %s205_s3 = inlined_call_operand.hbm [shape: f32[8,128], index: 3, kind: output, shape index: {}]  }
   0x1   :  { %v125_v0 = vld [vmem:[%s203_s1] sm:$0xff]   ;;  %114 = vmatprep.subr.bf16.mxu0 %v155_v1  ;;  %v126_v2 = vld [vmem:[%s203_s1 + $0x8] sm:$0xff]   ;;  %118 = vmatprep.mubr.msk.bf16.mxu0 %vm156_vm0, %v155_v1 }
   0x2   :  { %115 = vmatpush3.bf16.msra.mxu0 %v125_v0  ;;  %v16_v3 = vld [vmem:[%s202_s0] sm:$0xff] }
   0x3   :  { %8 = vsyncpa [#allocation3], 0  ;;  %116 = vmatprep.subr.bf16.mxu0 %v155_v1  ;;  %v17_v4 = vpack.c.bf16 %v16_v3, %v16_v3  ;;  %vm41_vm1 = vcmask 261120   ;;  %v106_v5 = vld [vmem:[%s204_s2] ss:$0 sm:$0xff]  ;;  %s157_s0 = smov [#allocation2]  }
   0x4   :  { %s98_s1 = sshll.u32 %s157_s0, 4  ;;  %s99_s1 = int_to_ptr.vmem [resolvable:$true] %s98_s1 }
   0x5   :  { %s131_s20 = scalar_lea.vmem %s99_s1, 128  ;;  %p136_p1 = scmp.lt.s32.totalorder %s99_s1, %s99_s1 }
   0x6   :  { %117 = vmatpush3.bf16.msra.mxu0 %v126_v2  ;;  %p132_p0 = scmp.ne.s32.totalorder %s99_s1, %s131_s20  ;;  %p137_p2 = scmp.lt.s32.totalorder %s131_s20, %s131_s20 }
   0x8   :  { %p138_p3 = por %p137_p2, %p136_p1 }
   0x9   :  { %119 = vmatmul.mubr.msk.bf16.vlgmr.msra.gmra.mrb[0].mxu0 %vm41_vm1, %v17_v4 }
   0xa   :  { %p139_p4 = pnand %p138_p3, %p132_p0 }
  0xdc   :  { %v79_v6 = vpop.f32.mrb[0].mxu0 }
  0xdd   :  { %v80_v7 = vadd.f32 %v106_v5, %v79_v6  ;;  %v120_v8 = vpop.f32.mrb[1].mxu0 }
  0xde   :  { %v82_v9 = vpop.f32.mrb[2].mxu0 }
  0xdf   :  { %v110_v10 = vmul.f32 -1.442695, %v80_v7  ;;  %v121_v11 = vpop.f32.mrb[3].mxu0 }
  0xe1   :  { %127 = vpow2.f32 %v110_v10 }
  0xeb   :  { %v128_v12 = vpop.eup %127 }
  0xec   :  { %v88_v13 = vadd.f32 1.0, %v128_v12 }
  0xee   :  { %129 = vrcp.f32 %v88_v13 }
  0xf8   :  { %v130_v14 = vpop.eup %129 }
  0xf9   :  { %91 = vst [vmem:[#allocation2] sm:$0xff] %v130_v14 }
  0xfa   :  { %142 = shalt.err (!%p139_p4)
}
  0xfb   :  { %s143_s22 = scalar_lea.hbm %s205_s3, 128 }
  0xfc   :  { %p144_p5 = scmp.ne.s32.totalorder %s205_s3, %s143_s22  ;;  %p147_p6 = scmp.lt.u32.totalorder %s143_s22, %s205_s3 }
  0xfe   :  { %p149_p7 = pnand %p147_p6, %p144_p5 }
 0x100   :  { %152 = shalt.err (!%p149_p7)
}
 0x101   :  { %101 = dma.vmem_to_hbm [thread:$0]  %s99_s1, 128, %s205_s3, [#allocation3]  }
 0x102   :  { %153 = dma.done.wait [#allocation3], 128  }
 0x103   :  { %154 = vsyncadd [#allocation3], 4294967168 }
 0x104   :  { %105 = vsyncpa [#allocation3], 1 }

// kernel: conve_forward.2
= control target key start
LH: loop header
LB: loop body
LE: loop exit
PB: predicated region body
PF: predicated region fallthrough
CT: control target
= control target key end

     0   :  { %v280_v3 = vmov 0.0   ;;  %v281_v4 = vmov 0.0|0.0   ;;  %vm49_vm0 = vcmask 523264   ;;  %v39_v54 = vlaneseq  ;;  %s435_s1 = inlined_call_operand.vmem [shape: f32[64,144], index: 1, kind: input, shape index: {}]   ;;  %s436_s3 = inlined_call_operand.vmem [shape: f32[144,32], index: 3, kind: input, shape index: {}]   ;;  %s437_s0 = inlined_call_operand.vmem [shape: f32[8,64], index: 0, kind: input, shape index: {}]   ;;  %s438_s2 = inlined_call_operand.vmem [shape: f32[1,144], index: 2, kind: input, shape index: {}]   ;;  %s439_s4 = inlined_call_operand.vmem [shape: f32[1,32], index: 4, kind: input, shape index: {}]   ;;  %s440_s5 = inlined_call_operand.vmem [shape: f32[8,32], index: 5, kind: output, shape index: {}]  }
   0x1   :  { %v22_v0 = vld [vmem:[%s435_s1 + $0x8] sm:$0xff]  ;;  %v24_v1 = vld [vmem:[%s435_s1 + $0x18] sm:$0xff]  ;;  %v21_v2 = vld [vmem:[%s435_s1] sm:$0xff]  ;;  %117 = vmatprep.mubr.f32.mxu0 %v280_v3  ;;  %251 = vmatprep.subr.bf16.mxu1 %v281_v4  ;;  %vm151_vm1 = vcmask 130048   ;;  %vm226_vm2 = vcmask 261120  }
   0x2   :  { %v235_v5 = vpack.c.bf16 %v24_v1, %v22_v0  ;;  %v23_v6 = vld [vmem:[%s435_s1 + $0x10] sm:$0xff]  ;;  %v26_v7 = vld [vmem:[%s435_s1 + $0x28] sm:$0xff]  ;;  %v28_v8 = vld [vmem:[%s435_s1 + $0x38] sm:$0xff]  ;;  %v40_v55 = vshrl.u32 %v39_v54, 7 }
   0x3   :  { %v237_v9 = vpack.c.bf16 %v23_v6, %v21_v2  ;;  %v239_v10 = vpack.c.bf16 %v28_v8, %v26_v7  ;;  %v25_v11 = vld [vmem:[%s435_s1 + $0x20] sm:$0xff]  ;;  %v27_v12 = vld [vmem:[%s435_s1 + $0x30] sm:$0xff]  ;;  %v30_v13 = vld [vmem:[%s435_s1 + $0x48] sm:$0xff] }
   0x4   :  { %236 = vmatprep.subr.bf16.mxu0 %v235_v5  ;;  %v32_v14 = vld [vmem:[%s435_s1 + $0x58] sm:$0xff]  ;;  %v241_v15 = vpack.c.bf16 %v27_v12, %v25_v11  ;;  %v29_v16 = vld [vmem:[%s435_s1 + $0x40] sm:$0xff]  ;;  %v31_v17 = vld [vmem:[%s435_s1 + $0x50] sm:$0xff]  ;;  %v41_v56 = vsub.s32 0, %v40_v55  ;;  %v45_v58 = vsub.s32 1, %v40_v55 }
   0x5   :  { %238 = vmatpush1.bf16.msra.mxu0 %v237_v9  ;;  %v243_v18 = vpack.c.bf16 %v32_v14, %v30_v13  ;;  %v34_v19 = vld [vmem:[%s435_s1 + $0x68] sm:$0xff]  ;;  %v36_v20 = vld [vmem:[%s435_s1 + $0x78] sm:$0xff]  ;;  %v126_v21 = vld [vmem:[%s436_s3] sm:$0xff]  ;;  %v245_v26 = vpack.c.bf16 %v31_v17, %v29_v16 }
   0x6   :  { %240 = vmatprep.subr.bf16.mxu0 %v239_v10  ;;  %v127_v22 = vld [vmem:[%s436_s3 + $0x8] sm:$0xff]  ;;  %v128_v23 = vld [vmem:[%s436_s3 + $0x10] sm:$0xff]  ;;  %v129_v24 = vld [vmem:[%s436_s3 + $0x18] sm:$0xff]  ;;  %v247_v27 = vpack.c.bf16 %v36_v20, %v34_v19 }
   0x7   :  { %v252_v25 = vpack.c.bf16 %v127_v22, %v126_v21  ;;  %v33_v28 = vld [vmem:[%s435_s1 + $0x60] sm:$0xff]  ;;  %v35_v29 = vld [vmem:[%s435_s1 + $0x70] sm:$0xff]  ;;  %v255_v30 = vpack.c.bf16 %v129_v24, %v128_v23  ;;  %v131_v32 = vld [vmem:[%s436_s3 + $0x28] sm:$0xff] }
   0x8   :  { %v130_v31 = vld [vmem:[%s436_s3 + $0x20] sm:$0xff]  ;;  %v249_v33 = vpack.c.bf16 %v35_v29, %v33_v28  ;;  %v132_v35 = vld [vmem:[%s436_s3 + $0x30] sm:$0xff]  ;;  %v133_v36 = vld [vmem:[%s436_s3 + $0x38] sm:$0xff] }
   0x9   :  { %242 = vmatpush1.bf16.msra.mxu0 %v241_v15  ;;  %253 = vmatpush1.bf16.msra.mxu1 %v252_v25  ;;  %v258_v34 = vpack.c.bf16 %v131_v32, %v130_v31  ;;  %v20_v37 = vld [vmem:[%s437_s0] sm:$0xff]  ;;  %v261_v38 = vpack.c.bf16 %v133_v36, %v132_v35  ;;  %v135_v40 = vld [vmem:[%s436_s3 + $0x48] sm:$0xff]  ;;  %v136_v42 = vld [vmem:[%s436_s3 + $0x50] sm:$0xff] }
   0xa   :  { %244 = vmatprep.subr.bf16.mxu0 %v243_v18  ;;  %254 = vmatprep.subr.bf16.mxu1 %v281_v4  ;;  %v134_v39 = vld [vmem:[%s436_s3 + $0x40] sm:$0xff]  ;;  %v137_v43 = vld [vmem:[%s436_s3 + $0x58] sm:$0xff]  ;;  %v139_v46 = vld [vmem:[%s436_s3 + $0x68] sm:$0xff] }
   0xb   :  { %v264_v41 = vpack.c.bf16 %v135_v40, %v134_v39  ;;  %v267_v44 = vpack.c.bf16 %v137_v43, %v136_v42  ;;  %v138_v45 = vld [vmem:[%s436_s3 + $0x60] sm:$0xff]  ;;  %v140_v48 = vld [vmem:[%s436_s3 + $0x70] sm:$0xff]  ;;  %v141_v49 = vld [vmem:[%s436_s3 + $0x78] sm:$0xff] }
   0xc   :  { %v270_v47 = vpack.c.bf16 %v139_v46, %v138_v45  ;;  %v273_v50 = vpack.c.bf16 %v141_v49, %v140_v48  ;;  %v142_v51 = vld [vmem:[%s436_s3 + $0x80] sm:$0xff]  ;;  %v143_v52 = vld [vmem:[%s436_s3 + $0x88] sm:$0xff] }
   0xd   :  { %246 = vmatpush1.bf16.msra.mxu0 %v245_v26  ;;  %256 = vmatpush1.bf16.msra.mxu1 %v255_v30  ;;  %v276_v53 = vpack.c.bf16 %v143_v52, %v142_v51  ;;  %v37_v57 = vld [vmem:[%s438_s2] sm:$0x3] }
   0xe   :  { %248 = vmatprep.subr.bf16.mxu0 %v247_v27  ;;  %257 = vmatprep.subr.bf16.mxu1 %v281_v4  ;;  %v42_v59 = vrot.slane %v37_v57, %v41_v56  ;;  %v46_v60 = vrot.slane %v37_v57, %v45_v58  ;;  %v233_v3 = vld [vmem:[%s439_s4] ss:$0 sm:$0xff] }
  0x11   :  { %250 = vmatpush1.bf16.msra.mxu0 %v249_v33  ;;  %259 = vmatpush1.bf16.msra.mxu1 %v258_v34 }
  0x12   :  { %260 = vmatprep.subr.bf16.mxu1 %v281_v4 }
  0x14   :  { %232 = vmatmul.mubr.msk.f32.vlgmr.msra.gmra.mrb[0].mxu0 %vm49_vm0, %v20_v37 }
  0x15   :  { %262 = vmatpush1.bf16.msra.mxu1 %v261_v38 }
  0x16   :  { %263 = vmatprep.subr.bf16.mxu1 %v281_v4 }
  0x19   :  { %265 = vmatpush1.bf16.msra.mxu1 %v264_v41 }
  0x1a   :  { %266 = vmatprep.subr.bf16.mxu1 %v281_v4 }
  0x1d   :  { %268 = vmatpush1.bf16.msra.mxu1 %v267_v44 }
  0x1e   :  { %269 = vmatprep.subr.bf16.mxu1 %v281_v4 }
  0x21   :  { %271 = vmatpush1.bf16.msra.mxu1 %v270_v47 }
  0x22   :  { %272 = vmatprep.subr.bf16.mxu1 %v281_v4 }
  0x25   :  { %274 = vmatpush1.bf16.msra.mxu1 %v273_v50 }
  0x26   :  { %275 = vmatprep.subr.bf16.mxu1 %v281_v4 }
  0x29   :  { %277 = vmatpush1.bf16.msra.mxu1 %v276_v53 }
  0xe7   :  { %v119_v61 = vpop.f32.mrb[0].mxu0 }
  0xe8   :  { %v120_v62 = vadd.f32 %v119_v61, %v42_v59  ;;  %v121_v63 = vpop.f32.mrb[1].mxu0 }
  0xe9   :  { %v122_v0 = vadd.f32 %v121_v63, %v46_v60 }
  0xea   :  { %v124_v2 = vmax.f32 %v120_v62, 0.0 }
  0xeb   :  { %v125_v1 = vmax.f32 %v122_v0, 0.0 }
  0xed   :  { %234 = vmatprep.mubr.msk.f32.mxu1 %vm151_vm1, %v125_v1 }
  0xee   :  { %220 = vmatmul.mubr.f32.vlgmr.msra.gmra.mrb[0].mxu1 %v124_v2 }
 0x1c1   :  { %v221_v4 = vpop.f32.mrb[0].mxu1 }
 0x1c2   :  { %v222_v5 = vadd.f32 %v233_v3, %v221_v4  ;;  %v223_v6 = vpop.f32.mrb[1].mxu1 }
 0x1c4   :  { %v225_v7 = vmax.f32 %v222_v5, 0.0 }
 0x1c6   :  { %227 = vst.msk [vmem:[%s440_s5] sm:$0xff] %vm226_vm2, %v225_v7 }

</bundles_post_ra>
